<compile_context>
chip_gen: v7x
topology: tpu7x:2x2x1
jax: 0.10.0
libtpu: 0.0.40
codegen_flags: <defaults>
</compile_context>

<pallas_src>
import functools

import jax
import jax.numpy as jnp
from jax.experimental import pallas as pl
from jax.experimental.pallas import tpu as pltpu


def _contrastive_kernel(
    im_hbm_ref, s_hbm_ref, mat_ref,                     # inputs
    num_ref, cnt_ref,                                   # per-split (1,1,1) outputs
    z_im_ref, z_s_ref, d1_col_ref, d2_row_ref,          # scratch
    acc_cost_ref, acc_cnt_ref, sem,
    *, margin, n, d, tile_m, n_tiles, tiles_per_split, padded_rows,
):
    c = pl.program_id(0)           # core / split index ("parallel")
    i = pl.program_id(1)           # row-tile index within the split ("arbitrary")
    eps = 1e-12                    # F.normalize eps

    # ---- hoisted once per split at its first grid step ----------------------
    @pl.when(i == 0)
    def _init():
        if padded_rows > n:
            pad = padded_rows - n
            # Deterministic tail rows (never DMA'd). Correctness itself only
            # relies on the row_ok select below, but zeroing keeps things sane.
            z_im_ref[pl.ds(n, pad), :] = jnp.zeros((pad, d), jnp.float32)
            z_s_ref[pl.ds(n, pad), :] = jnp.zeros((pad, d), jnp.float32)
            dst_im = z_im_ref.at[pl.ds(0, n)]
            dst_s = z_s_ref.at[pl.ds(0, n)]
        else:
            dst_im = z_im_ref
            dst_s = z_s_ref
        # One-shot DMA of the raw embeddings; no double-buffered resident copies
        # of im/s ever sit in VMEM next to the normalized scratch.
        cp_im = pltpu.make_async_copy(im_hbm_ref, dst_im, sem.at[0])
        cp_s = pltpu.make_async_copy(s_hbm_ref, dst_s, sem.at[1])
        cp_im.start()
        cp_s.start()
        cp_im.wait()
        cp_s.wait()

        # Normalize in place (zero tail rows stay zero: 0 / max(0, eps) = 0).
        zi = z_im_ref[...]
        zs = z_s_ref[...]
        zi = zi / jnp.maximum(jnp.sqrt(jnp.sum(zi * zi, axis=1, keepdims=True)), eps)
        zs = zs / jnp.maximum(jnp.sqrt(jnp.sum(zs * zs, axis=1, keepdims=True)), eps)
        z_im_ref[...] = zi
        z_s_ref[...] = zs

        prod = zi * zs                                   # diag(scores)[k] = z_im[k].z_s[k]
        d1_col_ref[...] = jnp.sum(prod, axis=1, keepdims=True)     # (padded_rows, 1)
        # (1, D) x (N, D)^T contraction lands the diagonal on the lane axis
        # directly (no sublane->lane relayout / transpose needed).
        d2_row_ref[...] = jax.lax.dot_general(
            jnp.ones((1, d), jnp.float32), prod[:n, :],
            (((1,), (1,)), ((), ())), preferred_element_type=jnp.float32)   # (1, N)

        acc_cost_ref[...] = jnp.zeros_like(acc_cost_ref)
        acc_cnt_ref[...] = jnp.zeros_like(acc_cnt_ref)

    # ---- per row-tile work ---------------------------------------------------
    gt = c * tiles_per_split + i                         # global row-tile index
    gt_c = jnp.minimum(gt, n_tiles - 1)                  # clamp pad tiles (odd split)
    row_start = pl.multiple_of(gt_c * tile_m, tile_m)

    zi_t = z_im_ref[pl.ds(row_start, tile_m), :]         # (TM, D) normalized rows
    zs_t = z_s_ref[pl.ds(row_start, tile_m), :]          # (TM, D)
    d1 = d1_col_ref[pl.ds(row_start, tile_m), :]         # (TM, 1) diag as rows
    d2 = d2_row_ref[...]                                 # (1, N)  diag as cols

    if padded_rows == n:
        rhs_s = z_s_ref[...]
        rhs_im = z_im_ref[...]
    else:
        rhs_s = z_s_ref[pl.ds(0, n), :]
        rhs_im = z_im_ref[pl.ds(0, n), :]

    # scores row-tile and transposed-scores row-tile (two MXU contractions).
    a_blk = jax.lax.dot_general(zi_t, rhs_s, (((1,), (1,)), ((), ())),
                                preferred_element_type=jnp.float32)   # (TM, N)
    b_blk = jax.lax.dot_general(zs_t, rhs_im, (((1,), (1,)), ((), ())),
                                preferred_element_type=jnp.float32)   # (TM, N) = scores.T tile

    mat = mat_ref[...].astype(jnp.float32)               # (TM, N)

    # Only tiny (TM,1)/(1,N) iotas; diagonal excluded positionally.
    row_ids = gt * tile_m + jax.lax.broadcasted_iota(jnp.int32, (tile_m, 1), 0)
    col_ids = jax.lax.broadcasted_iota(jnp.int32, (1, n), 1)
    diag_m = row_ids == col_ids                          # (TM, N)
    row_ok = row_ids < n                                 # (TM, 1) partial-tile / pad-tile guard

    base = jnp.logical_and(jnp.logical_and(jnp.logical_not(diag_m), mat != 1.0), row_ok)
    keep_s = jnp.logical_and(base, a_blk != d1)          # ~mask1 & ~mask3
    keep_im = jnp.logical_and(base, b_blk != d2)         # ~mask2 & ~mask3

    cost_s = jnp.maximum(margin + a_blk - d1, 0.0)
    cost_im = jnp.maximum(margin + a_blk - d2, 0.0)

    # Select (not multiply) so garbage/NaN in masked rows never propagates.
    tile_cost = jnp.where(keep_s, cost_s, 0.0) + jnp.where(keep_im, cost_im, 0.0)
    acc_cost_ref[...] += jnp.sum(tile_cost, axis=0, keepdims=True)          # (1, N)
    mask3 = jnp.logical_and(mat == 1.0, row_ok)
    acc_cnt_ref[...] += jnp.sum(mask3.astype(jnp.float32), axis=0, keepdims=True)

    # ---- per-split finalize: single cross-lane reduce ------------------------
    @pl.when(i == pl.num_programs(1) - 1)
    def _final():
        num_ref[...] = jnp.sum(acc_cost_ref[...]).reshape(1, 1, 1)
        cnt_ref[...] = jnp.sum(acc_cnt_ref[...]).reshape(1, 1, 1)


def _pick_tiling(n):
    """Generation-aware tile_m / VMEM limit selection."""
    vmem_bytes = 64 * 1024 * 1024                     # assume v7x (smallest VMEM)
    try:
        vmem_bytes = int(pltpu.get_tpu_info().vmem_capacity_bytes)
    except Exception:
        pass
    kind = ""
    try:
        kind = str(getattr(jax.devices()[0], "device_kind", "")).lower()
    except Exception:
        pass
    if n <= 128:
        tile_m = max(int(n), 1)
    else:
        # v6e (128 MiB VMEM, 256-wide MXU): TM=256. v7x (64 MiB) / v5e (128-wide
        # MXU): TM<=128. Halve further if ~10 live (TM, N) f32 tiles would blow
        # ~40% of VMEM (keeps v7x away from OOM / spills at large N).
        tile_m = 256 if (vmem_bytes >= (100 << 20) and "v5" not in kind) else 128
        budget = int(vmem_bytes * 0.4)
        while tile_m > 32 and 10 * tile_m * n * 4 > budget:
            tile_m //= 2
    vmem_limit = max(32 * 1024 * 1024,
                     min(int(vmem_bytes * 3 // 4), 100 * 1024 * 1024))
    return tile_m, vmem_limit


def contrastive_loss(im, s, matrix, margin=0.5, tile_m=None, num_splits=None):
    n, d = im.shape
    assert s.shape == (n, d) and matrix.shape == (n, n)

    im32 = im.astype(jnp.float32)
    s32 = s.astype(jnp.float32)
    mat32 = matrix.astype(jnp.float32)

    auto_tm, vmem_limit = _pick_tiling(n)
    if tile_m is None:
        tile_m = auto_tm
    tile_m = max(1, min(int(tile_m), n))
    n_tiles = pl.cdiv(n, tile_m)

    # Leading "parallel" axis for v7x's two TensorCores (sequential, i.e.
    # harmless, on single-core chips). Disabled when there is a single tile.
    if num_splits is None:
        num_splits = 2 if n_tiles >= 2 else 1
    num_splits = max(1, min(int(num_splits), n_tiles))
    tiles_per_split = pl.cdiv(n_tiles, num_splits)
    padded_rows = n_tiles * tile_m

    kernel = functools.partial(
        _contrastive_kernel, margin=float(margin), n=n, d=d, tile_m=tile_m,
        n_tiles=n_tiles, tiles_per_split=tiles_per_split, padded_rows=padded_rows)

    if num_splits * tiles_per_split > n_tiles:
        # Odd split: the last split owns one pad tile; clamp its matrix block
        # index (its rows are fully masked out by row_ok in the kernel).
        def mat_index(c, i):
            return (jnp.minimum(c * tiles_per_split + i, n_tiles - 1), 0)
    else:
        def mat_index(c, i):
            return (c * tiles_per_split + i, 0)

    cost = pl.CostEstimate(
        flops=4 * n * n * d + 12 * n * n,
        transcendentals=0,
        bytes_accessed=(2 * n * d + n * n) * 4 + 8 * num_splits,
    )

    num_parts, cnt_parts = pl.pallas_call(
        kernel,
        out_shape=(jax.ShapeDtypeStruct((num_splits, 1, 1), jnp.float32),
                   jax.ShapeDtypeStruct((num_splits, 1, 1), jnp.float32)),
        grid=(num_splits, tiles_per_split),
        in_specs=[
            pl.BlockSpec(memory_space=pl.ANY),             # im, raw HBM (DMA'd once)
            pl.BlockSpec(memory_space=pl.ANY),             # s,  raw HBM (DMA'd once)
            pl.BlockSpec((tile_m, n), mat_index),          # matrix row tile
        ],
        out_specs=(pl.BlockSpec((1, 1, 1), lambda c, i: (c, 0, 0)),
                   pl.BlockSpec((1, 1, 1), lambda c, i: (c, 0, 0))),
        scratch_shapes=[
            pltpu.VMEM((padded_rows, d), jnp.float32),     # normalized im (rows + RHS)
            pltpu.VMEM((padded_rows, d), jnp.float32),     # normalized s  (rows + RHS)
            pltpu.VMEM((padded_rows, 1), jnp.float32),     # diag(scores) as a column
            pltpu.VMEM((1, n), jnp.float32),               # diag(scores) as a row
            pltpu.VMEM((1, n), jnp.float32),               # per-column cost accumulator
            pltpu.VMEM((1, n), jnp.float32),               # per-column mask3 count accumulator
            pltpu.SemaphoreType.DMA((2,)),                 # im / s copy semaphores
        ],
        compiler_params=pltpu.CompilerParams(
            dimension_semantics=("parallel", "arbitrary"),
            vmem_limit_bytes=int(vmem_limit),
        ),
        cost_estimate=cost,
    )(im32, s32, mat32)

    denom = jnp.float32(n * n - n) - jnp.sum(cnt_parts)
    return jnp.sum(num_parts) / denom


def _reference_loss(im, s, matrix, margin=0.5):
    """Pure-JAX mirror of the PyTorch ContrastiveLoss (measure='dot')."""
    def norm(x):
        return x / jnp.maximum(jnp.linalg.norm(x, axis=1, keepdims=True), 1e-12)

    im_n, s_n = norm(im), norm(s)
    scores = im_n @ s_n.T
    diagonal = jnp.diag(scores).reshape(-1, 1)
    d1 = jnp.broadcast_to(diagonal, scores.shape)
    d2 = jnp.broadcast_to(diagonal.T, scores.shape)
    cost_s = jnp.maximum(margin + scores - d1, 0.0)
    cost_im = jnp.maximum(margin + scores - d2, 0.0)
    mask1 = scores == d1
    mask2 = mask1.T
    mask3 = matrix == 1
    cost_s = jnp.where(mask1 | mask3, 0.0, cost_s)
    cost_im = jnp.where(mask2 | mask3, 0.0, cost_im)
    n = im.shape[0]
    denom = n * n - jnp.sum(mask3) - n
    return (jnp.sum(cost_s) + jnp.sum(cost_im)) / denom


if __name__ == "__main__":
    key = jax.random.PRNGKey(0)
    k1, k2, k3, k4, k5 = jax.random.split(key, 5)

    # Small smoke test (single tile, single split).
    N, D = 8, 32
    im = jax.random.normal(k1, (N, D), dtype=jnp.float32)
    s = jax.random.normal(k2, (N, D), dtype=jnp.float32)
    matrix = (jnp.zeros((N, N), jnp.float32)
              .at[0, 3].set(1.0)
              .at[3, 0].set(1.0)
              .at[5, 5].set(1.0))
    loss = contrastive_loss(im, s, matrix, margin=0.5)
    jax.block_until_ready(loss)
    ref = _reference_loss(im, s, matrix, margin=0.5)
    assert jnp.allclose(loss, ref, rtol=1e-5, atol=1e-5), (loss, ref)

    # Multi-tile / two-split path: exercises the streamed reduction, dynamic
    # row-tile slicing of the normalized scratch and per-split partial outputs.
    N2, D2 = 256, 64
    im2 = jax.random.normal(k3, (N2, D2), dtype=jnp.float32)
    s2 = jax.random.normal(k4, (N2, D2), dtype=jnp.float32)
    matrix2 = (jax.random.uniform(k5, (N2, N2)) < 0.02).astype(jnp.float32)
    loss2 = contrastive_loss(im2, s2, matrix2, margin=0.5, tile_m=128, num_splits=2)
    jax.block_until_ready(loss2)
    ref2 = _reference_loss(im2, s2, matrix2, margin=0.5)
    assert jnp.allclose(loss2, ref2, rtol=2e-3, atol=2e-3), (loss2, ref2)

    print("KERNEL_OK")
</pallas_src>

<mosaic_0001>
module attributes {stable_mosaic.version = 11 : i64} {
  func.func @_contrastive_kernel(%arg0: i32, %arg1: i32, %arg2: memref<8x32xf32, #tpu.memory_space<any>>, %arg3: memref<8x32xf32, #tpu.memory_space<any>>, %arg4: memref<8x8xf32, #tpu.memory_space<vmem>>, %arg5: memref<1x1x1xf32, #tpu.memory_space<vmem>>, %arg6: memref<1x1x1xf32, #tpu.memory_space<vmem>>, %arg7: memref<8x32xf32, #tpu.memory_space<vmem>>, %arg8: memref<8x32xf32, #tpu.memory_space<vmem>>, %arg9: memref<8x1xf32, #tpu.memory_space<vmem>>, %arg10: memref<1x8xf32, #tpu.memory_space<vmem>>, %arg11: memref<1x8xf32, #tpu.memory_space<vmem>>, %arg12: memref<1x8xf32, #tpu.memory_space<vmem>>, %arg13: memref<2x!tpu.dma_semaphore, #tpu.memory_space<semaphore_mem>>) attributes {dimension_semantics = [#tpu.dimension_semantics<parallel>, #tpu.dimension_semantics<arbitrary>], iteration_bounds = array<i64: 1, 1>, scalar_prefetch = 0 : i64, scratch_operands = 7 : i64, tpu.core_type = #tpu.core_type<tc>, window_params = [{}, {}, {transform_indices = @transform_2, window_bounds = array<i64: 8, 8>}, {transform_indices = @transform_3, window_bounds = array<i64: 1, 1, 1>}, {transform_indices = @transform_4, window_bounds = array<i64: 1, 1, 1>}]} {
    %c0_i32 = arith.constant 0 : i32
    %0 = arith.cmpi eq, %arg1, %c0_i32 : i32
    %1 = arith.extui %0 : i1 to i32
    %c0_i32_0 = arith.constant 0 : i32
    %2 = arith.cmpi ne, %1, %c0_i32_0 : i32
    scf.if %2 {
      %c0_i32_36 = arith.constant 0 : i32
      %78 = tpu.memref_slice %arg13[%c0_i32_36] : memref<2x!tpu.dma_semaphore, #tpu.memory_space<semaphore_mem>> -> memref<1x!tpu.dma_semaphore, #tpu.memory_space<semaphore_mem>>
      %79 = tpu.memref_squeeze %78 : memref<1x!tpu.dma_semaphore, #tpu.memory_space<semaphore_mem>> -> memref<!tpu.dma_semaphore, #tpu.memory_space<semaphore_mem>>
      tpu.enqueue_dma source(%arg2 : memref<8x32xf32, #tpu.memory_space<any>>) target(%arg7 : memref<8x32xf32, #tpu.memory_space<vmem>>) target_semaphore(%79 : memref<!tpu.dma_semaphore, #tpu.memory_space<semaphore_mem>>)
      %c1_i32_37 = arith.constant 1 : i32
      %80 = tpu.memref_slice %arg13[%c1_i32_37] : memref<2x!tpu.dma_semaphore, #tpu.memory_space<semaphore_mem>> -> memref<1x!tpu.dma_semaphore, #tpu.memory_space<semaphore_mem>>
      %81 = tpu.memref_squeeze %80 : memref<1x!tpu.dma_semaphore, #tpu.memory_space<semaphore_mem>> -> memref<!tpu.dma_semaphore, #tpu.memory_space<semaphore_mem>>
      tpu.enqueue_dma source(%arg3 : memref<8x32xf32, #tpu.memory_space<any>>) target(%arg8 : memref<8x32xf32, #tpu.memory_space<vmem>>) target_semaphore(%81 : memref<!tpu.dma_semaphore, #tpu.memory_space<semaphore_mem>>)
      %c0_i32_38 = arith.constant 0 : i32
      %82 = tpu.memref_slice %arg13[%c0_i32_38] : memref<2x!tpu.dma_semaphore, #tpu.memory_space<semaphore_mem>> -> memref<1x!tpu.dma_semaphore, #tpu.memory_space<semaphore_mem>>
      %83 = tpu.memref_squeeze %82 : memref<1x!tpu.dma_semaphore, #tpu.memory_space<semaphore_mem>> -> memref<!tpu.dma_semaphore, #tpu.memory_space<semaphore_mem>>
      tpu.wait_dma2 semaphore(%83 : memref<!tpu.dma_semaphore, #tpu.memory_space<semaphore_mem>>) src(%arg2 : memref<8x32xf32, #tpu.memory_space<any>>) dst(%arg7 : memref<8x32xf32, #tpu.memory_space<vmem>>)
      %c1_i32_39 = arith.constant 1 : i32
      %84 = tpu.memref_slice %arg13[%c1_i32_39] : memref<2x!tpu.dma_semaphore, #tpu.memory_space<semaphore_mem>> -> memref<1x!tpu.dma_semaphore, #tpu.memory_space<semaphore_mem>>
      %85 = tpu.memref_squeeze %84 : memref<1x!tpu.dma_semaphore, #tpu.memory_space<semaphore_mem>> -> memref<!tpu.dma_semaphore, #tpu.memory_space<semaphore_mem>>
      tpu.wait_dma2 semaphore(%85 : memref<!tpu.dma_semaphore, #tpu.memory_space<semaphore_mem>>) src(%arg3 : memref<8x32xf32, #tpu.memory_space<any>>) dst(%arg8 : memref<8x32xf32, #tpu.memory_space<vmem>>)
      %c0_40 = arith.constant 0 : index
      %c0_41 = arith.constant 0 : index
      %86 = vector.load %arg7[%c0_40, %c0_41] : memref<8x32xf32, #tpu.memory_space<vmem>>, vector<8x32xf32>
      %c0_42 = arith.constant 0 : index
      %c0_43 = arith.constant 0 : index
      %87 = vector.load %arg8[%c0_42, %c0_43] : memref<8x32xf32, #tpu.memory_space<vmem>>, vector<8x32xf32>
      %88 = arith.mulf %86, %86 : vector<8x32xf32>
      %cst_44 = arith.constant dense<0.000000e+00> : vector<8xf32>
      %89 = vector.multi_reduction <add>, %88, %cst_44 [1] : vector<8x32xf32> to vector<8xf32>
      %90 = vector.shape_cast %89 : vector<8xf32> to vector<8x1xf32>
      %91 = math.sqrt %90 : vector<8x1xf32>
      %cst_45 = arith.constant 9.99999996E-13 : f32
      %92 = vector.broadcast %cst_45 : f32 to vector<8x1xf32>
      %93 = arith.maximumf %91, %92 : vector<8x1xf32>
      %94 = vector.broadcast %93 : vector<8x1xf32> to vector<8x32xf32>
      %95 = arith.divf %86, %94 : vector<8x32xf32>
      %96 = arith.mulf %87, %87 : vector<8x32xf32>
      %cst_46 = arith.constant dense<0.000000e+00> : vector<8xf32>
      %97 = vector.multi_reduction <add>, %96, %cst_46 [1] : vector<8x32xf32> to vector<8xf32>
      %98 = vector.shape_cast %97 : vector<8xf32> to vector<8x1xf32>
      %99 = math.sqrt %98 : vector<8x1xf32>
      %cst_47 = arith.constant 9.99999996E-13 : f32
      %100 = vector.broadcast %cst_47 : f32 to vector<8x1xf32>
      %101 = arith.maximumf %99, %100 : vector<8x1xf32>
      %102 = vector.broadcast %101 : vector<8x1xf32> to vector<8x32xf32>
      %103 = arith.divf %87, %102 : vector<8x32xf32>
      %c0_48 = arith.constant 0 : index
      %c0_49 = arith.constant 0 : index
      %104 = vector.load %arg7[%c0_48, %c0_49] : memref<8x32xf32, #tpu.memory_space<vmem>>, vector<8x32xf32>
      tpu.vector_store %arg7[%c0_48, %c0_49], %95 {strides = array<i32>} : memref<8x32xf32, #tpu.memory_space<vmem>>, vector<8x32xf32>,
      %c0_50 = arith.constant 0 : index
      %c0_51 = arith.constant 0 : index
      %105 = vector.load %arg8[%c0_50, %c0_51] : memref<8x32xf32, #tpu.memory_space<vmem>>, vector<8x32xf32>
      tpu.vector_store %arg8[%c0_50, %c0_51], %103 {strides = array<i32>} : memref<8x32xf32, #tpu.memory_space<vmem>>, vector<8x32xf32>,
      %106 = arith.mulf %95, %103 : vector<8x32xf32>
      %cst_52 = arith.constant dense<0.000000e+00> : vector<8xf32>
      %107 = vector.multi_reduction <add>, %106, %cst_52 [1] : vector<8x32xf32> to vector<8xf32>
      %108 = vector.shape_cast %107 : vector<8xf32> to vector<8x1xf32>
      %c0_53 = arith.constant 0 : index
      %c0_54 = arith.constant 0 : index
      %109 = vector.load %arg9[%c0_53, %c0_54] : memref<8x1xf32, #tpu.memory_space<vmem>>, vector<8x1xf32>
      tpu.vector_store %arg9[%c0_53, %c0_54], %108 {strides = array<i32>} : memref<8x1xf32, #tpu.memory_space<vmem>>, vector<8x1xf32>,
      %cst_55 = arith.constant 1.000000e+00 : f32
      %110 = vector.broadcast %cst_55 : f32 to vector<1x32xf32>
      %cst_56 = arith.constant dense<0.000000e+00> : vector<1x8xf32>
      %111 = tpu.matmul %110, %106, %cst_56 {dimension_numbers = #tpu.dot_dimension_numbers<[1], [1], [0], [0], [0, 0, 1, 0], [], []>} : vector<1x32xf32>, vector<8x32xf32>, vector<1x8xf32> -> vector<1x8xf32>
      %c0_57 = arith.constant 0 : index
      %c0_58 = arith.constant 0 : index
      %112 = vector.load %arg10[%c0_57, %c0_58] : memref<1x8xf32, #tpu.memory_space<vmem>>, vector<1x8xf32>
      tpu.vector_store %arg10[%c0_57, %c0_58], %111 {strides = array<i32>} : memref<1x8xf32, #tpu.memory_space<vmem>>, vector<1x8xf32>,
      %cst_59 = arith.constant 0.000000e+00 : f32
      %113 = vector.broadcast %cst_59 : f32 to vector<1x8xf32>
      %c0_60 = arith.constant 0 : index
      %c0_61 = arith.constant 0 : index
      %114 = vector.load %arg11[%c0_60, %c0_61] : memref<1x8xf32, #tpu.memory_space<vmem>>, vector<1x8xf32>
      tpu.vector_store %arg11[%c0_60, %c0_61], %113 {strides = array<i32>} : memref<1x8xf32, #tpu.memory_space<vmem>>, vector<1x8xf32>,
      %cst_62 = arith.constant 0.000000e+00 : f32
      %115 = vector.broadcast %cst_62 : f32 to vector<1x8xf32>
      %c0_63 = arith.constant 0 : index
      %c0_64 = arith.constant 0 : index
      %116 = vector.load %arg12[%c0_63, %c0_64] : memref<1x8xf32, #tpu.memory_space<vmem>>, vector<1x8xf32>
      tpu.vector_store %arg12[%c0_63, %c0_64], %115 {strides = array<i32>} : memref<1x8xf32, #tpu.memory_space<vmem>>, vector<1x8xf32>,
    } else {
    }
    %c1_i32 = arith.constant 1 : i32
    %3 = arith.muli %arg0, %c1_i32 : i32
    %4 = arith.addi %3, %arg1 : i32
    %c0_i32_1 = arith.constant 0 : i32
    %5 = arith.minsi %4, %c0_i32_1 : i32
    %c8_i32 = arith.constant 8 : i32
    %6 = arith.muli %5, %c8_i32 : i32
    %7 = tpu.assume_multiple %6, 8 : i32
    %8 = arith.index_cast %7 : i32 to index
    %c0 = arith.constant 0 : index
    %9 = vector.load %arg7[%8, %c0] : memref<8x32xf32, #tpu.memory_space<vmem>>, vector<8x32xf32>
    %10 = arith.index_cast %7 : i32 to index
    %c0_2 = arith.constant 0 : index
    %11 = vector.load %arg8[%10, %c0_2] : memref<8x32xf32, #tpu.memory_space<vmem>>, vector<8x32xf32>
    %12 = arith.index_cast %7 : i32 to index
    %c0_3 = arith.constant 0 : index
    %13 = vector.load %arg9[%12, %c0_3] : memref<8x1xf32, #tpu.memory_space<vmem>>, vector<8x1xf32>
    %c0_4 = arith.constant 0 : index
    %c0_5 = arith.constant 0 : index
    %14 = vector.load %arg10[%c0_4, %c0_5] : memref<1x8xf32, #tpu.memory_space<vmem>>, vector<1x8xf32>
    %c0_6 = arith.constant 0 : index
    %c0_7 = arith.constant 0 : index
    %15 = vector.load %arg8[%c0_6, %c0_7] : memref<8x32xf32, #tpu.memory_space<vmem>>, vector<8x32xf32>
    %c0_8 = arith.constant 0 : index
    %c0_9 = arith.constant 0 : index
    %16 = vector.load %arg7[%c0_8, %c0_9] : memref<8x32xf32, #tpu.memory_space<vmem>>, vector<8x32xf32>
    %cst = arith.constant dense<0.000000e+00> : vector<8x8xf32>
    %17 = tpu.matmul %9, %15, %cst {dimension_numbers = #tpu.dot_dimension_numbers<[1], [1], [0], [0], [0, 0, 1, 0], [], []>} : vector<8x32xf32>, vector<8x32xf32>, vector<8x8xf32> -> vector<8x8xf32>
    %cst_10 = arith.constant dense<0.000000e+00> : vector<8x8xf32>
    %18 = tpu.matmul %11, %16, %cst_10 {dimension_numbers = #tpu.dot_dimension_numbers<[1], [1], [0], [0], [0, 0, 1, 0], [], []>} : vector<8x32xf32>, vector<8x32xf32>, vector<8x8xf32> -> vector<8x8xf32>
    %c0_11 = arith.constant 0 : index
    %c0_12 = arith.constant 0 : index
    %19 = vector.load %arg4[%c0_11, %c0_12] : memref<8x8xf32, #tpu.memory_space<vmem>>, vector<8x8xf32>
    %c8_i32_13 = arith.constant 8 : i32
    %20 = arith.muli %4, %c8_i32_13 : i32
    %21 = tpu.iota {dimensions = array<i32: 0>} : vector<8x1xi32>
    %22 = vector.broadcast %20 : i32 to vector<8x1xi32>
    %23 = arith.addi %22, %21 : vector<8x1xi32>
    %24 = tpu.iota {dimensions = array<i32: 1>} : vector<1x8xi32>
    %25 = vector.broadcast %23 : vector<8x1xi32> to vector<8x8xi32>
    %26 = vector.broadcast %24 : vector<1x8xi32> to vector<8x8xi32>
    %27 = arith.cmpi eq, %25, %26 : vector<8x8xi32>
    %c8_i32_14 = arith.constant 8 : i32
    %28 = vector.broadcast %c8_i32_14 : i32 to vector<8x1xi32>
    %29 = arith.cmpi slt, %23, %28 : vector<8x1xi32>
    %cst_15 = arith.constant dense<true> : vector<8x8xi1>
    %30 = arith.xori %27, %cst_15 : vector<8x8xi1>
    %cst_16 = arith.constant 1.000000e+00 : f32
    %31 = vector.broadcast %cst_16 : f32 to vector<8x8xf32>
    %32 = arith.cmpf one, %19, %31 : vector<8x8xf32>
    %33 = arith.andi %30, %32 : vector<8x8xi1>
    %34 = vector.broadcast %29 : vector<8x1xi1> to vector<8x8xi1>
    %35 = arith.andi %33, %34 : vector<8x8xi1>
    %36 = vector.broadcast %13 : vector<8x1xf32> to vector<8x8xf32>
    %37 = arith.cmpf one, %17, %36 : vector<8x8xf32>
    %38 = arith.andi %35, %37 : vector<8x8xi1>
    %39 = vector.broadcast %14 : vector<1x8xf32> to vector<8x8xf32>
    %40 = arith.cmpf one, %18, %39 : vector<8x8xf32>
    %41 = arith.andi %35, %40 : vector<8x8xi1>
    %cst_17 = arith.constant 5.000000e-01 : f32
    %42 = vector.broadcast %cst_17 : f32 to vector<8x8xf32>
    %43 = arith.addf %42, %17 : vector<8x8xf32>
    %44 = vector.broadcast %13 : vector<8x1xf32> to vector<8x8xf32>
    %45 = arith.subf %43, %44 : vector<8x8xf32>
    %cst_18 = arith.constant 0.000000e+00 : f32
    %46 = vector.broadcast %cst_18 : f32 to vector<8x8xf32>
    %47 = arith.maximumf %45, %46 : vector<8x8xf32>
    %cst_19 = arith.constant 5.000000e-01 : f32
    %48 = vector.broadcast %cst_19 : f32 to vector<8x8xf32>
    %49 = arith.addf %48, %17 : vector<8x8xf32>
    %50 = vector.broadcast %14 : vector<1x8xf32> to vector<8x8xf32>
    %51 = arith.subf %49, %50 : vector<8x8xf32>
    %cst_20 = arith.constant 0.000000e+00 : f32
    %52 = vector.broadcast %cst_20 : f32 to vector<8x8xf32>
    %53 = arith.maximumf %51, %52 : vector<8x8xf32>
    %cst_21 = arith.constant 0.000000e+00 : f32
    %54 = vector.broadcast %cst_21 : f32 to vector<8x8xf32>
    %55 = arith.select %38, %47, %54 : vector<8x8xi1>, vector<8x8xf32>
    %cst_22 = arith.constant 0.000000e+00 : f32
    %56 = vector.broadcast %cst_22 : f32 to vector<8x8xf32>
    %57 = arith.select %41, %53, %56 : vector<8x8xi1>, vector<8x8xf32>
    %58 = arith.addf %55, %57 : vector<8x8xf32>
    %c0_23 = arith.constant 0 : index
    %c0_24 = arith.constant 0 : index
    %59 = vector.load %arg11[%c0_23, %c0_24] : memref<1x8xf32, #tpu.memory_space<vmem>>, vector<1x8xf32>
    %cst_25 = arith.constant dense<0.000000e+00> : vector<8xf32>
    %60 = vector.multi_reduction <add>, %58, %cst_25 [0] : vector<8x8xf32> to vector<8xf32>
    %61 = vector.shape_cast %60 : vector<8xf32> to vector<1x8xf32>
    %62 = arith.addf %59, %61 : vector<1x8xf32>
    %c0_26 = arith.constant 0 : index
    %c0_27 = arith.constant 0 : index
    %63 = vector.load %arg11[%c0_26, %c0_27] : memref<1x8xf32, #tpu.memory_space<vmem>>, vector<1x8xf32>
    tpu.vector_store %arg11[%c0_26, %c0_27], %62 {strides = array<i32>} : memref<1x8xf32, #tpu.memory_space<vmem>>, vector<1x8xf32>,
    %cst_28 = arith.constant 1.000000e+00 : f32
    %64 = vector.broadcast %cst_28 : f32 to vector<8x8xf32>
    %65 = arith.cmpf oeq, %19, %64 : vector<8x8xf32>
    %66 = vector.broadcast %29 : vector<8x1xi1> to vector<8x8xi1>
    %67 = arith.andi %65, %66 : vector<8x8xi1>
    %c0_29 = arith.constant 0 : index
    %c0_30 = arith.constant 0 : index
    %68 = vector.load %arg12[%c0_29, %c0_30] : memref<1x8xf32, #tpu.memory_space<vmem>>, vector<1x8xf32>
    %69 = arith.extui %67 : vector<8x8xi1> to vector<8x8xi32>
    %70 = arith.sitofp %69 : vector<8x8xi32> to vector<8x8xf32>
    %cst_31 = arith.constant dense<0.000000e+00> : vector<8xf32>
    %71 = vector.multi_reduction <add>, %70, %cst_31 [0] : vector<8x8xf32> to vector<8xf32>
    %72 = vector.shape_cast %71 : vector<8xf32> to vector<1x8xf32>
    %73 = arith.addf %68, %72 : vector<1x8xf32>
    %c0_32 = arith.constant 0 : index
    %c0_33 = arith.constant 0 : index
    %74 = vector.load %arg12[%c0_32, %c0_33] : memref<1x8xf32, #tpu.memory_space<vmem>>, vector<1x8xf32>
    tpu.vector_store %arg12[%c0_32, %c0_33], %73 {strides = array<i32>} : memref<1x8xf32, #tpu.memory_space<vmem>>, vector<1x8xf32>,
    %c0_i32_34 = arith.constant 0 : i32
    %75 = arith.cmpi eq, %arg1, %c0_i32_34 : i32
    %76 = arith.extui %75 : i1 to i32
    %c0_i32_35 = arith.constant 0 : i32
    %77 = arith.cmpi ne, %76, %c0_i32_35 : i32
    scf.if %77 {
      %c0_36 = arith.constant 0 : index
      %c0_37 = arith.constant 0 : index
      %78 = vector.load %arg11[%c0_36, %c0_37] : memref<1x8xf32, #tpu.memory_space<vmem>>, vector<1x8xf32>
      %79 = vector.shape_cast %78 : vector<1x8xf32> to vector<1x1x8xf32>
      %cst_38 = arith.constant dense<0.000000e+00> : vector<1xf32>
      %80 = vector.multi_reduction <add>, %79, %cst_38 [1, 2] : vector<1x1x8xf32> to vector<1xf32>
      %81 = vector.shape_cast %80 : vector<1xf32> to vector<1x1x1xf32>
      %82 = vector.extract %81[0, 0, 0] : f32 from vector<1x1x1xf32>
      %83 = vector.broadcast %82 : f32 to vector<1x1x1xf32>
      %c0_39 = arith.constant 0 : index
      %c0_40 = arith.constant 0 : index
      %c0_41 = arith.constant 0 : index
      %84 = vector.load %arg5[%c0_39, %c0_40, %c0_41] : memref<1x1x1xf32, #tpu.memory_space<vmem>>, vector<1x1x1xf32>
      tpu.vector_store %arg5[%c0_39, %c0_40, %c0_41], %83 {strides = array<i32>} : memref<1x1x1xf32, #tpu.memory_space<vmem>>, vector<1x1x1xf32>,
      %c0_42 = arith.constant 0 : index
      %c0_43 = arith.constant 0 : index
      %85 = vector.load %arg12[%c0_42, %c0_43] : memref<1x8xf32, #tpu.memory_space<vmem>>, vector<1x8xf32>
      %86 = vector.shape_cast %85 : vector<1x8xf32> to vector<1x1x8xf32>
      %cst_44 = arith.constant dense<0.000000e+00> : vector<1xf32>
      %87 = vector.multi_reduction <add>, %86, %cst_44 [1, 2] : vector<1x1x8xf32> to vector<1xf32>
      %88 = vector.shape_cast %87 : vector<1xf32> to vector<1x1x1xf32>
      %89 = vector.extract %88[0, 0, 0] : f32 from vector<1x1x1xf32>
      %90 = vector.broadcast %89 : f32 to vector<1x1x1xf32>
      %c0_45 = arith.constant 0 : index
      %c0_46 = arith.constant 0 : index
      %c0_47 = arith.constant 0 : index
      %91 = vector.load %arg6[%c0_45, %c0_46, %c0_47] : memref<1x1x1xf32, #tpu.memory_space<vmem>>, vector<1x1x1xf32>
      tpu.vector_store %arg6[%c0_45, %c0_46, %c0_47], %90 {strides = array<i32>} : memref<1x1x1xf32, #tpu.memory_space<vmem>>, vector<1x1x1xf32>,
    } else {
    }
    return
  }
  func.func @transform_2(%arg0: i32, %arg1: i32) -> (i32, i32) {
    %c1_i32 = arith.constant 1 : i32
    %0 = arith.muli %arg0, %c1_i32 : i32
    %1 = arith.addi %0, %arg1 : i32
    %c0_i32 = arith.constant 0 : i32
    %c0_i32_0 = arith.constant 0 : i32
    return %1, %c0_i32 : i32, i32
  }
  func.func @transform_3(%arg0: i32, %arg1: i32) -> (i32, i32, i32) {
    %c0_i32 = arith.constant 0 : i32
    %c0_i32_0 = arith.constant 0 : i32
    %c0_i32_1 = arith.constant 0 : i32
    return %arg0, %c0_i32, %c0_i32_0 : i32, i32, i32
  }
  func.func @transform_4(%arg0: i32, %arg1: i32) -> (i32, i32, i32) {
    %c0_i32 = arith.constant 0 : i32
    %c0_i32_0 = arith.constant 0 : i32
    %c0_i32_1 = arith.constant 0 : i32
    return %arg0, %c0_i32, %c0_i32_0 : i32, i32, i32
  }
}

</mosaic_0001>

<bundles_post_ra>
// kernel: tpu_custom_call.1
= control target key start
LH: loop header
LB: loop body
LE: loop exit
PB: predicated region body
PF: predicated region fallthrough
CT: control target
= control target key end

     0   :  { %10 = vsyncpa [#allocation10], 0  ;;  %s785_s0 = inlined_call_operand.hbm [shape: f32[8,32], index: 0, kind: input, shape index: {}]   ;;  %s786_s1 = inlined_call_operand.hbm [shape: f32[8,32], index: 1, kind: input, shape index: {}]   ;;  %s787_s2 = inlined_call_operand.hbm [shape: f32[8,8], index: 2, kind: input, shape index: {}]   ;;  %s788_s3 = inlined_call_operand.hbm [shape: f32[1,1,1], index: 3, kind: output, shape index: {0}]   ;;  %s789_s4 = inlined_call_operand.hbm [shape: f32[1,1,1], index: 4, kind: output, shape index: {1}]  }
   0x1   :  { %11 = vsyncpa [#allocation11], 0 }
   0x2   :  { %12 = vsyncpa [#allocation14], 0  ;;  %s665_s15 = smov [#allocation9]   ;;  %s545_s19 = scalar_lea.hbm %s787_s2, 128 }
   0x3   :  { %s22_s16 = sshll.u32 %s665_s15, 4  ;;  %p546_p0 = scmp.ne.s32.totalorder %s787_s2, %s545_s19  ;;  %s23_s16 = int_to_ptr.vmem [resolvable:$true] %s22_s16 }
   0x4   :  { %p549_p1 = scmp.lt.u32.totalorder %s545_s19, %s787_s2 }
   0x6   :  { %p551_p2 = pnand %p549_p1, %p546_p0 }
   0x8   :  { %554 = shalt.err (!%p551_p2)
}
   0x9   :  { %s555_s24 = scalar_lea.vmem %s23_s16, 128  ;;  %p560_p4 = scmp.lt.s32.totalorder %s23_s16, %s23_s16 }
   0xa   :  { %p556_p3 = scmp.ne.s32.totalorder %s23_s16, %s555_s24  ;;  %p561_p5 = scmp.lt.s32.totalorder %s555_s24, %s555_s24 }
   0xc   :  { %p562_p6 = por %p561_p5, %p560_p4 }
   0xe   :  { %p563_p7 = pnand %p562_p6, %p556_p3 }
  0x10   :  { %566 = shalt.err (!%p563_p7)
}
  0x11   :  { %25 = dma.hbm_to_vmem [thread:$0]  %s787_s2, 128, %s23_s16, [#allocation10]  }
  0x12   :  { %655 = dma.done.wait [#allocation10], 128  }
  0x13   :  { %656 = vsyncadd [#allocation10], 4294967168  ;;  %s666_s27 = smov [#allocation2]   ;;  %s667_s29 = smov [#allocation3]  }
  0x14   :  { %s41_s28 = sshll.u32 %s666_s27, 4  ;;  %s53_s30 = sshll.u32 %s667_s29, 4  ;;  %s42_s28 = int_to_ptr.vmem [resolvable:$true] %s41_s28  ;;  %s54_s30 = int_to_ptr.vmem [resolvable:$true] %s53_s30 }
  0x15   :  { %s567_s7 = scalar_lea.hbm %s785_s0, 128 }
  0x16   :  { %p568_p8 = scmp.ne.s32.totalorder %s785_s0, %s567_s7  ;;  %p571_p9 = scmp.lt.u32.totalorder %s567_s7, %s785_s0 }
  0x18   :  { %p573_p10 = pnand %p571_p9, %p568_p8 }
  0x1a   :  { %576 = shalt.err (!%p573_p10)  }
  0x1b   :  { %s577_s2 = scalar_lea.vmem %s42_s28, 128  ;;  %p582_p12 = scmp.lt.s32.totalorder %s42_s28, %s42_s28 }
  0x1c   :  { %p578_p11 = scmp.ne.s32.totalorder %s42_s28, %s577_s2  ;;  %p583_p13 = scmp.lt.s32.totalorder %s577_s2, %s577_s2 }
  0x1e   :  { %p584_p0 = por %p583_p13, %p582_p12 }
  0x20   :  { %p585_p1 = pnand %p584_p0, %p578_p11 }
  0x22   :  { %588 = shalt.err (!%p585_p1)  }
  0x23   :  { %44 = dma.hbm_to_vmem [thread:$0]  %s785_s0, 128, %s42_s28, [#allocation8] }
  0x24   :  { %s589_s16 = scalar_lea.hbm %s786_s1, 128 }
  0x25   :  { %p590_p2 = scmp.ne.s32.totalorder %s786_s1, %s589_s16  ;;  %p593_p3 = scmp.lt.u32.totalorder %s589_s16, %s786_s1 }
  0x27   :  { %p595_p4 = pnand %p593_p3, %p590_p2 }
  0x29   :  { %598 = shalt.err (!%p595_p4)  }
  0x2a   :  { %s599_s21 = scalar_lea.vmem %s54_s30, 128  ;;  %p604_p6 = scmp.lt.s32.totalorder %s54_s30, %s54_s30 }
  0x2b   :  { %p600_p5 = scmp.ne.s32.totalorder %s54_s30, %s599_s21  ;;  %p605_p7 = scmp.lt.s32.totalorder %s599_s21, %s599_s21 }
  0x2d   :  { %p606_p8 = por %p605_p7, %p604_p6 }
  0x2f   :  { %p607_p9 = pnand %p606_p8, %p600_p5 }
  0x31   :  { %610 = shalt.err (!%p607_p9)  }
  0x32   :  { %56 = dma.hbm_to_vmem [thread:$0]  %s786_s1, 128, %s54_s30, [#allocation8 + $0x1] }
  0x33   :  { %657 = dma.done.wait [#allocation8], 128 }
  0x34   :  { %658 = vsyncadd [#allocation8], 4294967168 }
  0x35   :  { %659 = dma.done.wait [#allocation8 + $0x1], 128 }
  0x36   :  { %660 = vsyncadd [#allocation8 + $0x1], 4294967168  ;;  %v62_v0 = vld [vmem:[#allocation2] sm:$0xff]  ;;  %vm65_vm0 = vcmask 261120   ;;  %v63_v1 = vld [vmem:[#allocation3] sm:$0xff]  ;;  %v668_v6 = vmov 0.0   ;;  %v349_v44 = vlaneseq }
  0x37   :  { %v64_v2 = vmul.f32 %v62_v0, %v62_v0  ;;  %v79_v3 = vmul.f32 %v63_v1, %v63_v1  ;;  %506 = vmatprep.subr.mxu0 %v668_v6  ;;  %511 = vmatprep.subr.mxu1 %v668_v6  ;;  %vm669_vm1 = vmmov 0   ;;  %v670_v27 = vmov 1.0   ;;  %v347_v31 = vld [vmem:[#allocation9] sm:$0xff]  ;;  %s673_s1 = smov [#allocation12]   ;;  %s674_s25 = smov [#allocation13]  }
  0x38   :  { %508 = vmatprep.mubr.msk.f32.mxu0 %vm669_vm1, %v668_v6  ;;  %513 = vmatprep.mubr.msk.f32.mxu1 %vm669_vm1, %v668_v6  ;;  %v671_v30 = vmov 0   ;;  %vm177_vm6 = vcmask 57344   ;;  %vm398_vm7 = vcmp.eq.f32.partialorder %v347_v31, 1.0  ;;  %vm387_vm8 = vcmask 64512   ;;  %s448_s23 = sshll.u32 %s673_s1, 4  ;;  %s458_s26 = sshll.u32 %s674_s25, 4  ;;  %s449_s23 = int_to_ptr.vmem [resolvable:$true] %s448_s23  ;;  %s459_s26 = int_to_ptr.vmem [resolvable:$true] %s458_s26 }
  0x39   :  { %v66_v4 = vsel %vm65_vm0, %v64_v2, 0.0  ;;  %v80_v5 = vsel %vm65_vm0, %v79_v3, 0.0  ;;  %535 = vset.pattern.permute.xlu1 %v671_v30  ;;  %536 = vset.pattern.permute.xlu0 %v671_v30  ;;  %180 = vst.msk [vmem:[#allocation7] sm:$0x1] %vm177_vm6, %v668_v6  ;;  %179 = vst.msk [vmem:[#allocation6] sm:$0x1] %vm177_vm6, %v668_v6  ;;  %p616_p11 = scmp.lt.s32.totalorder %s449_s23, %s449_s23 }
  0x3a   :  { %67 = vadd.xlane.f32.xlu0 %v66_v4  ;;  %v497_v32 = vsel %vm398_vm7, 1.0, %v668_v6  ;;  %vm99_vm9 = vcmask 7168   ;;  %v350_v45 = vshrl.u32 %v349_v44, 7  ;;  %v354_v46 = vand.u32 127, %v349_v44  ;;  %s611_s27 = scalar_lea.vmem %s449_s23, 16  ;;  %s615_s28 = scalar_lea.vmem %s449_s23, 32 }
  0x3b   :  { %v403_v33 = vsel %vm387_vm8, %v497_v32, 0.0  ;;  %vm672_vm11 = vmmov 1   ;;  %vm358_vm13 = vcmp.ne.f32.partialorder %v347_v31, 1.0  ;;  %p612_p10 = scmp.ne.s32.totalorder %s449_s23, %s611_s27  ;;  %p617_p12 = scmp.lt.s32.totalorder %s615_s28, %s611_s27 }
  0x3c   :  { %v404_v34 = vrot.slane %v403_v33, 4  ;;  %vm355_vm10 = vcmp.eq.s32.totalorder %v350_v45, %v354_v46 }
  0x3d   :  { %vm357_vm12 = vmxor %vm355_vm10, %vm672_vm11  ;;  %p618_p13 = por %p617_p12, %p616_p11 }
  0x3e   :  { %81 = vadd.xlane.f32.xlu0 %v80_v5  ;;  %v405_v35 = vadd.f32 %v404_v34, %v403_v33  ;;  %vm359_vm14 = vmand %vm357_vm12, %vm358_vm13 }
  0x3f   :  { %p619_p0 = pnand %p618_p13, %p612_p10 }
  0x40   :  { %v406_v36 = vrot.slane %v405_v35, 2  ;;  %v400_v39 = vld [vmem:[#allocation7] sm:$0x1]  ;;  %v386_v5 = vld [vmem:[#allocation6] sm:$0x1] }
  0x42   :  { %v407_v37 = vadd.f32 %v406_v36, %v405_v35 }
  0x44   :  { %v408_v38 = vrot.slane %v407_v37, 1 }
  0x46   :  { %v409_v40 = vadd.f32 %v408_v38, %v407_v37 }
  0x48   :  { %v410_v41 = vadd.f32 %v409_v40, %v400_v39 }
  0x4a   :  { %411 = vst.msk [vmem:[#allocation7] sm:$0x1] %vm177_vm6, %v410_v41 }
  0xc7   :  { %v68_v7 = vpop.xlane.xlu0 %67 }
  0xc8   :  { %537 = vrsqrt.f32 %v68_v7  ;;  %vm71_vm2 = vcmp.eq.f32.partialorder %v68_v7, inf  ;;  %v74_v11 = vand.u32 2147483648, %v68_v7  ;;  %vm73_vm3 = vcmp.eq.f32.partialorder %v68_v7, 0.0 }
  0xcb   :  { %v82_v8 = vpop.xlane.xlu0 %81 }
  0xcc   :  { %539 = vrsqrt.f32 %v82_v8  ;;  %vm85_vm4 = vcmp.eq.f32.partialorder %v82_v8, inf  ;;  %v88_v17 = vand.u32 2147483648, %v82_v8  ;;  %vm87_vm5 = vcmp.eq.f32.partialorder %v82_v8, 0.0 }
  0xd2   :  { %v538_v9 = vpop.eup %537 }
  0xd3   :  { %v70_v10 = vmul.f32 %v538_v9, %v68_v7  ;;  %v429_v9 = vld [vmem:[#allocation7] sm:$0x1] }
  0xd5   :  { %v72_v12 = vsel %vm71_vm2, %v68_v7, %v70_v10 }
  0xd6   :  { %v540_v13 = vpop.eup %539  ;;  %v75_v14 = vsel %vm73_vm3, %v74_v11, %v72_v12  ;;  %v430_v11 = vsel %vm177_vm6, %v429_v9, 0.0  ;;  %vm427_vm3 = vcmask 0  }
  0xd7   :  { %v76_v15 = vmax.f32 %v75_v14, 1e-12  ;;  %v84_v16 = vmul.f32 %v540_v13, %v82_v8 }
  0xd9   :  { %541 = vrcp.f32 %v76_v15  ;;  %v86_v18 = vsel %vm85_vm4, %v82_v8, %v84_v16 }
  0xda   :  { %v89_v19 = vsel %vm87_vm5, %v88_v17, %v86_v18 }
  0xdb   :  { %v90_v20 = vmax.f32 %v89_v19, 1e-12 }
  0xdd   :  { %543 = vrcp.f32 %v90_v20 }
  0xe3   :  { %v542_v21 = vpop.eup %541 }
  0xe4   :  { %v78_v22 = vmul.f32 %v542_v21, %v62_v0 }
  0xe6   :  { %93 = vst.msk [vmem:[#allocation2] sm:$0xff] %vm65_vm0, %v78_v22 }
  0xe7   :  { %v544_v23 = vpop.eup %543 }
  0xe8   :  { %v92_v24 = vmul.f32 %v544_v23, %v63_v1 }
  0xea   :  { %94 = vst.msk [vmem:[#allocation3] sm:$0xff] %vm65_vm0, %v92_v24  ;;  %v95_v25 = vmul.f32 %v92_v24, %v78_v22 }
  0xec   :  { %507 = vmatpush3.xpose.msk.msra.mxu0 %vm65_vm0, %v95_v25  ;;  %v96_v26 = vsel %vm65_vm0, %v95_v25, 0.0 }
  0xed   :  { %97 = vadd.xlane.f32.xlu1 %v96_v26  ;;  %516 = vmatprep.subr.mxu0 %v668_v6  ;;  %v193_v28 = vld [vmem:[#allocation2] sm:$0xff] }
  0xef   :  { %509 = vmatmul.mubr.msk.f32.vlgmr.msra.gmra.mrb[0].mxu0 %vm65_vm0, %v670_v27 }
  0xf0   :  { %517 = vmatpush3.xpose.msk.msra.mxu0 %vm65_vm0, %v193_v28  ;;  %518 = vmatprep.mubr.msk.f32.mxu0 %vm669_vm1, %v668_v6 }
  0xf1   :  { %v192_v29 = vld [vmem:[#allocation3] sm:$0xff] }
  0xf2   :  { %512 = vmatpush3.xpose.msk.msra.mxu1 %vm65_vm0, %v192_v29 }
  0xf3   :  { %519 = vmatmul.mubr.msk.f32.vlgmr.msra.gmra.mrb[2].mxu0 %vm65_vm0, %v192_v29 }
  0xf5   :  { %514 = vmatmul.mubr.msk.f32.vlgmr.msra.gmra.mrb[0].mxu1 %vm65_vm0, %v193_v28 }
 0x17a   :  { %v98_v42 = vpop.xlane.xlu1 %97 }
 0x17b   :  { %100 = vst.msk [vmem:[#allocation4] sm:$0xff] %vm99_vm9, %v98_v42 }
 0x182   :  { %v190_v43 = vld [vmem:[#allocation4] sm:$0xff] }
 0x183   :  { %365 = vperm.xlu1 %535, %v190_v43  }
 0x1c2   :  { %v173_v47 = vpop.f32.mrb[0].mxu0 }
 0x1c3   :  { %178 = vst.msk [vmem:[#allocation5] sm:$0x1] %vm177_vm6, %v173_v47  ;;  %v510_v48 = vpop.f32.mrb[1].mxu0 }
 0x1c6   :  { %v343_v49 = vpop.f32.mrb[2].mxu0 }
 0x1c7   :  { %v520_v50 = vpop.f32.mrb[3].mxu0 }
 0x1c8   :  { %v267_v51 = vpop.f32.mrb[0].mxu1 }
 0x1c9   :  { %v378_v52 = vadd.f32 0.5, %v267_v51  ;;  %v515_v53 = vpop.f32.mrb[1].mxu1 }
 0x1ca   :  { %v496_v54 = vld [vmem:[#allocation5] ss:$0 sm:$0xff] }
 0x1cb   :  { %vm376_vm15 = vcmp.ne.f32.partialorder %v343_v49, %v496_v54  ;;  %v381_v55 = vsub.f32 %v378_v52, %v496_v54 }
 0x1cc   :  { %vm377_vm0 = vmand %vm359_vm14, %vm376_vm15 }
 0x1cd   :  { %v382_v56 = vmax.f32 %v381_v55, 0.0 }
 0x1cf   :  { %v384_v57 = vsel %vm377_vm0, %v382_v56, 0.0 }
 0x202   :  { %v366_v58 = vpop.permute.xlu1 %365 }
 0x203   :  { %vm368_vm1 = vcmp.ne.f32.partialorder %v267_v51, %v366_v58  ;;  %v379_v59 = vsub.f32 %v378_v52, %v366_v58 }
 0x204   :  { %vm369_vm2 = vmand %vm359_vm14, %vm368_vm1 }
 0x205   :  { %v380_v60 = vmax.f32 %v379_v59, 0.0 }
 0x207   :  { %v383_v61 = vsel %vm369_vm2, %v380_v60, 0.0 }
 0x208   :  { %v385_v62 = vadd.f32 %v384_v57, %v383_v61 }
 0x20a   :  { %v388_v63 = vsel %vm387_vm8, %v385_v62, 0.0 }
 0x20b   :  { %v389_v0 = vrot.slane %v388_v63, 4 }
 0x20d   :  { %v390_v1 = vadd.f32 %v389_v0, %v388_v63 }
 0x20f   :  { %v391_v2 = vrot.slane %v390_v1, 2 }
 0x211   :  { %v392_v3 = vadd.f32 %v391_v2, %v390_v1 }
 0x213   :  { %v393_v4 = vrot.slane %v392_v3, 1 }
 0x215   :  { %v394_v6 = vadd.f32 %v393_v4, %v392_v3 }
 0x217   :  { %v395_v7 = vadd.f32 %v394_v6, %v386_v5 }
 0x219   :  { %397 = vst.msk [vmem:[#allocation6] sm:$0x1] %vm177_vm6, %v395_v7 }
 0x220   :  { %v415_v8 = vld [vmem:[#allocation6] sm:$0x1] }
 0x221   :  { %v416_v10 = vsel %vm177_vm6, %v415_v8, 0.0 }
 0x222   :  { %417 = vadd.xlane.f32.xlu0 %v416_v10 }
 0x226   :  { %431 = vadd.xlane.f32.xlu0 %v430_v11 }
 0x2af   :  { %v418_v12 = vpop.xlane.xlu0 %417 }
 0x2b0   :  { %v419_v13 = vrot.slane %v418_v12, 4 }
 0x2b2   :  { %v420_v14 = vadd.f32 %v419_v13, %v418_v12 }
 0x2b3   :  { %v432_v15 = vpop.xlane.xlu0 %431 }
 0x2b4   :  { %v421_v16 = vrot.slane %v420_v14, 2  ;;  %v433_v17 = vrot.slane %v432_v15, 4 }
 0x2b6   :  { %v434_v18 = vadd.f32 %v433_v17, %v432_v15  ;;  %v422_v19 = vadd.f32 %v421_v16, %v420_v14 }
 0x2b8   :  { %v435_v20 = vrot.slane %v434_v18, 2  ;;  %v423_v21 = vrot.slane %v422_v19, 1 }
 0x2ba   :  { %v436_v22 = vadd.f32 %v435_v20, %v434_v18  ;;  %v424_v23 = vadd.f32 %v423_v21, %v422_v19 }
 0x2bc   :  { %521 = vpush %v424_v23  ;;  %v437_v24 = vrot.slane %v436_v22, 1 }
 0x2be   :  { %v438_v25 = vadd.f32 %v437_v24, %v436_v22 }
 0x2c0   :  { %523 = vpush %v438_v25 }
 0x2ed   :  { %s522_s24 = spop %521 }
 0x2ee   :  { %v426_v26 = vstv %s522_s24 }
 0x2ef   :  { %428 = vst.msk [vmem:[#allocation12] sm:$0x1] %vm427_vm3, %v426_v26 }
 0x2f0   :  { %622 = shalt.err (!%p619_p0)
}
 0x2f1   :  { %s623_s5 = scalar_lea.hbm %s788_s3, 16 }
 0x2f2   :  { %p624_p1 = scmp.ne.s32.totalorder %s788_s3, %s623_s5  ;;  %p627_p2 = scmp.lt.u32.totalorder %s623_s5, %s788_s3 }
 0x2f4   :  { %p629_p3 = pnand %p627_p2, %p624_p1 }
 0x2f6   :  { %632 = shalt.err (!%p629_p3)
}
 0x2f7   :  { %451 = dma.vmem_to_hbm [thread:$0]  %s449_s23, 16, %s788_s3, [#allocation11]  }
 0x2f8   :  { %s524_s2 = spop %523  ;;  %s633_s12 = scalar_lea.vmem %s459_s26, 16 }
 0x2f9   :  { %v440_v27 = vstv %s524_s2  ;;  %p634_p4 = scmp.ne.s32.totalorder %s459_s26, %s633_s12  ;;  %s637_s13 = scalar_lea.vmem %s459_s26, 32 }
 0x2fa   :  { %441 = vst.msk [vmem:[#allocation13] sm:$0x1] %vm427_vm3, %v440_v27  ;;  %p638_p5 = scmp.lt.s32.totalorder %s459_s26, %s459_s26  ;;  %p639_p6 = scmp.lt.s32.totalorder %s637_s13, %s633_s12 }
 0x2fc   :  { %p640_p7 = por %p639_p6, %p638_p5 }
 0x2fe   :  { %p641_p8 = pnand %p640_p7, %p634_p4 }
 0x300   :  { %644 = shalt.err (!%p641_p8)
}
 0x301   :  { %s645_s16 = scalar_lea.hbm %s789_s4, 16 }
 0x302   :  { %p646_p9 = scmp.ne.s32.totalorder %s789_s4, %s645_s16  ;;  %p649_p10 = scmp.lt.u32.totalorder %s645_s16, %s789_s4 }
 0x304   :  { %p651_p11 = pnand %p649_p10, %p646_p9 }
 0x306   :  { %654 = shalt.err (!%p651_p11)
}
 0x307   :  { %461 = dma.vmem_to_hbm [thread:$0]  %s459_s26, 16, %s789_s4, [#allocation14]  }
 0x308   :  { %661 = dma.done.wait [#allocation11], 16  }
 0x309   :  { %662 = vsyncadd [#allocation11], 4294967280 }
 0x30a   :  { %663 = dma.done.wait [#allocation14], 16  }
 0x30b   :  { %664 = vsyncadd [#allocation14], 4294967280 }
 0x30c   :  { %468 = vsyncpa [#allocation10], 1 }
 0x30d   :  { %469 = vsyncpa [#allocation11], 1 }
 0x30e   :  { %470 = vsyncpa [#allocation14], 1 }
 0x30f   :  { %471 = vsyncmov [#allocation8] }
 0x312   :  { %s472_s0 = vpop.sfrf %471 }
 0x313   :  { %p498_p12 = scmp.ne.s32.totalorder %s472_s0, 0 }
 0x315   :  { %476 = shalt.err (%p498_p12)  }
 0x316   :  { %478 = vsyncmov [#allocation8 + $0x1] }
 0x319   :  { %s479_s22 = vpop.sfrf %478 }
 0x31a   :  { %p499_p13 = scmp.ne.s32.totalorder %s479_s22, 0 }
 0x31c   :  { %483 = shalt.err (%p499_p13)  }

</bundles_post_ra>
